<compile_context>
chip_gen: v6e
topology: v6e:2x2x1
jax: 0.10.0
libtpu: 0.0.40
codegen_flags: <defaults>
</compile_context>

<pallas_src>
import functools

import jax
import jax.numpy as jnp
from jax.experimental import pallas as pl
from jax.experimental.pallas import tpu as pltpu

SELU_ALPHA = 1.6732632423543772
SELU_SCALE = 1.0507009873554805

_LANE = 128   # lane tile (last dim)
_SUBLANE = 8  # f32 sublane tile (second-to-last dim)


def _round_up(n, m):
    return ((n + m - 1) // m) * m


def _mlp_kernel(x_ref, *refs, num_layers):
    """Fused MLP on one VMEM-resident batch tile.

    refs = (w0, b0, w1, b1, ..., w_{L-1}, b_{L-1}, out_ref).
    All intermediates live in vregs; nothing goes back to HBM between layers.
    """
    o_ref = refs[-1]
    wb = refs[:-1]
    x = x_ref[...]
    for li in range(num_layers):
        w = wb[2 * li][...]
        b = wb[2 * li + 1][...]          # (1, out) -> broadcast over batch
        y = jnp.dot(x, w, preferred_element_type=jnp.float32) + b
        if li < num_layers - 1:
            # SELU; exp argument clamped to <= 0 (no transient inf, EUP slot).
            y = SELU_SCALE * jnp.where(
                y > 0.0, y, SELU_ALPHA * (jnp.exp(jnp.minimum(y, 0.0)) - 1.0))
        x = y
    o_ref[...] = x.astype(o_ref.dtype)


def init_params(key, input_size, hidden_sizes, output_size):
    """Logical (unpadded) params matching nn.Linear shapes; weight stored as
    (in, out) == transpose of PyTorch's (out, in)."""
    sizes = [input_size] + list(hidden_sizes) + [output_size]
    params = []
    for li, (fan_in, fan_out) in enumerate(zip(sizes[:-1], sizes[1:])):
        kw, kb = jax.random.split(jax.random.fold_in(key, li))
        bound = 1.0 / jnp.sqrt(fan_in)
        w = jax.random.uniform(kw, (fan_in, fan_out), jnp.float32, -bound, bound)
        b = jax.random.uniform(kb, (1, fan_out), jnp.float32, -bound, bound)
        params.append((w, b))
    return params


def pad_params(params):
    """Zero-pad every layer's (in, out) feature dims up to multiples of 128.
    Done once at init so per-call work is only the padded-batch copy."""
    padded = []
    for w, b in params:
        fi, fo = w.shape
        fip, fop = _round_up(fi, _LANE), _round_up(fo, _LANE)
        wp = jnp.zeros((fip, fop), w.dtype).at[:fi, :fo].set(w)
        bp = jnp.zeros((1, fop), b.dtype).at[:, :fo].set(b)
        padded.append((wp, bp))
    return padded


def multilayer_qnet_forward(x, padded_params, output_size, *, batch_tile=256):
    """x: (B, input_size) float32. padded_params: output of pad_params()."""
    B, in_dim = x.shape
    num_layers = len(padded_params)
    in_p = padded_params[0][0].shape[0]
    out_p = padded_params[-1][0].shape[1]

    # Pad batch to the sublane tile and to a multiple of the batch tile.
    Bp = _round_up(max(B, _SUBLANE), _SUBLANE)
    bt = min(batch_tile, Bp)
    Bp = _round_up(Bp, bt)
    x_p = jnp.zeros((Bp, in_p), x.dtype).at[:B, :in_dim].set(x)

    flat_wb = []
    in_specs = [pl.BlockSpec((bt, in_p), lambda i: (i, 0))]
    flops = 0
    transcendentals = 0
    bytes_accessed = x_p.size * x_p.dtype.itemsize + Bp * out_p * x.dtype.itemsize
    for li, (w, b) in enumerate(padded_params):
        flat_wb += [w, b]
        in_specs.append(pl.BlockSpec(w.shape, lambda i: (0, 0)))  # weight resident
        in_specs.append(pl.BlockSpec(b.shape, lambda i: (0, 0)))
        flops += 2 * Bp * w.shape[0] * w.shape[1]
        bytes_accessed += (w.size + b.size) * w.dtype.itemsize
        if li < num_layers - 1:
            transcendentals += Bp * w.shape[1]

    kernel = functools.partial(_mlp_kernel, num_layers=num_layers)
    out_padded = pl.pallas_call(
        kernel,
        out_shape=jax.ShapeDtypeStruct((Bp, out_p), x.dtype),
        grid=(Bp // bt,),
        in_specs=in_specs,
        out_specs=pl.BlockSpec((bt, out_p), lambda i: (i, 0)),
        compiler_params=pltpu.CompilerParams(
            dimension_semantics=("parallel",),
        ),
        cost_estimate=pl.CostEstimate(
            flops=flops,
            transcendentals=transcendentals,
            bytes_accessed=bytes_accessed),
    )(x_p, *flat_wb)
    return out_padded[:B, :output_size]


def _reference_forward(x, params):
    # Pure-JAX reference (unpadded params) for correctness checking.
    for w, b in params[:-1]:
        y = x @ w + b
        x = SELU_SCALE * jnp.where(y > 0, y, SELU_ALPHA * jnp.expm1(y))
    w, b = params[-1]
    return x @ w + b


if __name__ == "__main__":
    key = jax.random.PRNGKey(0)
    batch = 2
    input_size = 16
    hidden_sizes = [32, 32]
    output_size = 4

    kx, kp = jax.random.split(key)
    x = jax.random.normal(kx, (batch, input_size), jnp.float32)
    params = init_params(kp, input_size, hidden_sizes, output_size)
    padded_params = pad_params(params)

    fwd = jax.jit(lambda xx, pp: multilayer_qnet_forward(xx, pp, output_size))
    out = fwd(x, padded_params)
    out = jax.block_until_ready(out)

    ref = _reference_forward(x, params)
    assert out.shape == (batch, output_size)
    assert jnp.allclose(out, ref, atol=1e-5, rtol=1e-5), (out, ref)

    print("KERNEL_OK")
</pallas_src>

<mosaic_0001>
module attributes {stable_mosaic.version = 11 : i64} {
  func.func @_mlp_kernel(%arg0: i32, %arg1: memref<8x128xf32, #tpu.memory_space<vmem>>, %arg2: memref<128x128xf32, #tpu.memory_space<vmem>>, %arg3: memref<1x128xf32, #tpu.memory_space<vmem>>, %arg4: memref<128x128xf32, #tpu.memory_space<vmem>>, %arg5: memref<1x128xf32, #tpu.memory_space<vmem>>, %arg6: memref<128x128xf32, #tpu.memory_space<vmem>>, %arg7: memref<1x128xf32, #tpu.memory_space<vmem>>, %arg8: memref<8x128xf32, #tpu.memory_space<vmem>>) attributes {dimension_semantics = [#tpu.dimension_semantics<parallel>], iteration_bounds = array<i64: 1>, scalar_prefetch = 0 : i64, scratch_operands = 0 : i64, tpu.core_type = #tpu.core_type<tc>, window_params = [{transform_indices = @transform_0, window_bounds = array<i64: 8, 128>}, {pipeline_mode = #tpu.pipeline_mode<synchronous>, transform_indices = @transform_1, window_bounds = array<i64: 128, 128>}, {pipeline_mode = #tpu.pipeline_mode<synchronous>, transform_indices = @transform_2, window_bounds = array<i64: 1, 128>}, {pipeline_mode = #tpu.pipeline_mode<synchronous>, transform_indices = @transform_3, window_bounds = array<i64: 128, 128>}, {pipeline_mode = #tpu.pipeline_mode<synchronous>, transform_indices = @transform_4, window_bounds = array<i64: 1, 128>}, {pipeline_mode = #tpu.pipeline_mode<synchronous>, transform_indices = @transform_5, window_bounds = array<i64: 128, 128>}, {pipeline_mode = #tpu.pipeline_mode<synchronous>, transform_indices = @transform_6, window_bounds = array<i64: 1, 128>}, {transform_indices = @transform_7, window_bounds = array<i64: 8, 128>}]} {
    %c0 = arith.constant 0 : index
    %c0_0 = arith.constant 0 : index
    %0 = vector.load %arg1[%c0, %c0_0] : memref<8x128xf32, #tpu.memory_space<vmem>>, vector<8x128xf32>
    %c0_1 = arith.constant 0 : index
    %c0_2 = arith.constant 0 : index
    %1 = vector.load %arg2[%c0_1, %c0_2] : memref<128x128xf32, #tpu.memory_space<vmem>>, vector<128x128xf32>
    %c0_3 = arith.constant 0 : index
    %c0_4 = arith.constant 0 : index
    %2 = vector.load %arg3[%c0_3, %c0_4] : memref<1x128xf32, #tpu.memory_space<vmem>>, vector<1x128xf32>
    %cst = arith.constant dense<0.000000e+00> : vector<8x128xf32>
    %3 = tpu.matmul %0, %1, %cst {dimension_numbers = #tpu.dot_dimension_numbers<[1], [0], [0], [1], [0, 0, 1, 1], [], []>} : vector<8x128xf32>, vector<128x128xf32>, vector<8x128xf32> -> vector<8x128xf32>
    %4 = vector.broadcast %2 : vector<1x128xf32> to vector<8x128xf32>
    %5 = arith.addf %3, %4 : vector<8x128xf32>
    %cst_5 = arith.constant 0.000000e+00 : f32
    %6 = vector.broadcast %cst_5 : f32 to vector<8x128xf32>
    %7 = arith.cmpf ogt, %5, %6 : vector<8x128xf32>
    %cst_6 = arith.constant 0.000000e+00 : f32
    %8 = vector.broadcast %cst_6 : f32 to vector<8x128xf32>
    %9 = arith.minimumf %5, %8 : vector<8x128xf32>
    %10 = math.exp %9 : vector<8x128xf32>
    %cst_7 = arith.constant 1.000000e+00 : f32
    %11 = vector.broadcast %cst_7 : f32 to vector<8x128xf32>
    %12 = arith.subf %10, %11 : vector<8x128xf32>
    %cst_8 = arith.constant 1.67326319 : f32
    %13 = vector.broadcast %cst_8 : f32 to vector<8x128xf32>
    %14 = arith.mulf %13, %12 : vector<8x128xf32>
    %15 = arith.select %7, %5, %14 : vector<8x128xi1>, vector<8x128xf32>
    %cst_9 = arith.constant 1.05070102 : f32
    %16 = vector.broadcast %cst_9 : f32 to vector<8x128xf32>
    %17 = arith.mulf %16, %15 : vector<8x128xf32>
    %c0_10 = arith.constant 0 : index
    %c0_11 = arith.constant 0 : index
    %18 = vector.load %arg4[%c0_10, %c0_11] : memref<128x128xf32, #tpu.memory_space<vmem>>, vector<128x128xf32>
    %c0_12 = arith.constant 0 : index
    %c0_13 = arith.constant 0 : index
    %19 = vector.load %arg5[%c0_12, %c0_13] : memref<1x128xf32, #tpu.memory_space<vmem>>, vector<1x128xf32>
    %cst_14 = arith.constant dense<0.000000e+00> : vector<8x128xf32>
    %20 = tpu.matmul %17, %18, %cst_14 {dimension_numbers = #tpu.dot_dimension_numbers<[1], [0], [0], [1], [0, 0, 1, 1], [], []>} : vector<8x128xf32>, vector<128x128xf32>, vector<8x128xf32> -> vector<8x128xf32>
    %21 = vector.broadcast %19 : vector<1x128xf32> to vector<8x128xf32>
    %22 = arith.addf %20, %21 : vector<8x128xf32>
    %cst_15 = arith.constant 0.000000e+00 : f32
    %23 = vector.broadcast %cst_15 : f32 to vector<8x128xf32>
    %24 = arith.cmpf ogt, %22, %23 : vector<8x128xf32>
    %cst_16 = arith.constant 0.000000e+00 : f32
    %25 = vector.broadcast %cst_16 : f32 to vector<8x128xf32>
    %26 = arith.minimumf %22, %25 : vector<8x128xf32>
    %27 = math.exp %26 : vector<8x128xf32>
    %cst_17 = arith.constant 1.000000e+00 : f32
    %28 = vector.broadcast %cst_17 : f32 to vector<8x128xf32>
    %29 = arith.subf %27, %28 : vector<8x128xf32>
    %cst_18 = arith.constant 1.67326319 : f32
    %30 = vector.broadcast %cst_18 : f32 to vector<8x128xf32>
    %31 = arith.mulf %30, %29 : vector<8x128xf32>
    %32 = arith.select %24, %22, %31 : vector<8x128xi1>, vector<8x128xf32>
    %cst_19 = arith.constant 1.05070102 : f32
    %33 = vector.broadcast %cst_19 : f32 to vector<8x128xf32>
    %34 = arith.mulf %33, %32 : vector<8x128xf32>
    %c0_20 = arith.constant 0 : index
    %c0_21 = arith.constant 0 : index
    %35 = vector.load %arg6[%c0_20, %c0_21] : memref<128x128xf32, #tpu.memory_space<vmem>>, vector<128x128xf32>
    %c0_22 = arith.constant 0 : index
    %c0_23 = arith.constant 0 : index
    %36 = vector.load %arg7[%c0_22, %c0_23] : memref<1x128xf32, #tpu.memory_space<vmem>>, vector<1x128xf32>
    %cst_24 = arith.constant dense<0.000000e+00> : vector<8x128xf32>
    %37 = tpu.matmul %34, %35, %cst_24 {dimension_numbers = #tpu.dot_dimension_numbers<[1], [0], [0], [1], [0, 0, 1, 1], [], []>} : vector<8x128xf32>, vector<128x128xf32>, vector<8x128xf32> -> vector<8x128xf32>
    %38 = vector.broadcast %36 : vector<1x128xf32> to vector<8x128xf32>
    %39 = arith.addf %37, %38 : vector<8x128xf32>
    %c0_25 = arith.constant 0 : index
    %c0_26 = arith.constant 0 : index
    %40 = vector.load %arg8[%c0_25, %c0_26] : memref<8x128xf32, #tpu.memory_space<vmem>>, vector<8x128xf32>
    tpu.vector_store %arg8[%c0_25, %c0_26], %39 {strides = array<i32>} : memref<8x128xf32, #tpu.memory_space<vmem>>, vector<8x128xf32>,
    return
  }
  func.func @transform_0(%arg0: i32) -> (i32, i32) {
    %c0_i32 = arith.constant 0 : i32
    %c0_i32_0 = arith.constant 0 : i32
    return %arg0, %c0_i32 : i32, i32
  }
  func.func @transform_1(%arg0: i32) -> (i32, i32) {
    %c0_i32 = arith.constant 0 : i32
    %c0_i32_0 = arith.constant 0 : i32
    %c0_i32_1 = arith.constant 0 : i32
    return %c0_i32, %c0_i32_0 : i32, i32
  }
  func.func @transform_2(%arg0: i32) -> (i32, i32) {
    %c0_i32 = arith.constant 0 : i32
    %c0_i32_0 = arith.constant 0 : i32
    %c0_i32_1 = arith.constant 0 : i32
    return %c0_i32, %c0_i32_0 : i32, i32
  }
  func.func @transform_3(%arg0: i32) -> (i32, i32) {
    %c0_i32 = arith.constant 0 : i32
    %c0_i32_0 = arith.constant 0 : i32
    %c0_i32_1 = arith.constant 0 : i32
    return %c0_i32, %c0_i32_0 : i32, i32
  }
  func.func @transform_4(%arg0: i32) -> (i32, i32) {
    %c0_i32 = arith.constant 0 : i32
    %c0_i32_0 = arith.constant 0 : i32
    %c0_i32_1 = arith.constant 0 : i32
    return %c0_i32, %c0_i32_0 : i32, i32
  }
  func.func @transform_5(%arg0: i32) -> (i32, i32) {
    %c0_i32 = arith.constant 0 : i32
    %c0_i32_0 = arith.constant 0 : i32
    %c0_i32_1 = arith.constant 0 : i32
    return %c0_i32, %c0_i32_0 : i32, i32
  }
  func.func @transform_6(%arg0: i32) -> (i32, i32) {
    %c0_i32 = arith.constant 0 : i32
    %c0_i32_0 = arith.constant 0 : i32
    %c0_i32_1 = arith.constant 0 : i32
    return %c0_i32, %c0_i32_0 : i32, i32
  }
  func.func @transform_7(%arg0: i32) -> (i32, i32) {
    %c0_i32 = arith.constant 0 : i32
    %c0_i32_0 = arith.constant 0 : i32
    return %arg0, %c0_i32 : i32, i32
  }
}

</mosaic_0001>

<bundles_post_ra>
// kernel: _lambda_.1
= control target key start
LH: loop header
LB: loop body
LE: loop exit
PB: predicated region body
PF: predicated region fallthrough
CT: control target
= control target key end

     0   :  { %12 = vsyncpa [#allocation3], 0  ;;  %s731_s0 = inlined_call_operand.vmem [shape: f32[8,128], index: 0, kind: input, shape index: {}]   ;;  %s732_s1 = inlined_call_operand.hbm [shape: f32[128,128], index: 1, kind: input, shape index: {}]   ;;  %s733_s2 = inlined_call_operand.vmem [shape: f32[1,128], index: 2, kind: input, shape index: {}]   ;;  %s734_s3 = inlined_call_operand.hbm [shape: f32[128,128], index: 3, kind: input, shape index: {}]   ;;  %s735_s4 = inlined_call_operand.vmem [shape: f32[1,128], index: 4, kind: input, shape index: {}]   ;;  %s736_s5 = inlined_call_operand.hbm [shape: f32[128,128], index: 5, kind: input, shape index: {}]   ;;  %s737_s6 = inlined_call_operand.vmem [shape: f32[1,128], index: 6, kind: input, shape index: {}]   ;;  %s738_s7 = inlined_call_operand.vmem [shape: f32[8,128], index: 7, kind: output, shape index: {}]  }
   0x1   :  { %13 = vsyncpa [#allocation5], 0  ;;  %s606_s24 = smov [#allocation4]   ;;  %s607_s26 = smov [#allocation2]  }
   0x2   :  { %s35_s25 = sshll.u32 %s606_s24, 4  ;;  %s21_s27 = sshll.u32 %s607_s26, 4  ;;  %s36_s25 = int_to_ptr.vmem [resolvable:$true] %s35_s25  ;;  %s22_s27 = int_to_ptr.vmem [resolvable:$true] %s21_s27 }
   0x3   :  { %s550_s28 = scalar_lea.vmem %s36_s25, 2048  ;;  %p555_p1 = scmp.lt.s32.totalorder %s36_s25, %s36_s25 }
   0x4   :  { %p551_p0 = scmp.ne.s32.totalorder %s36_s25, %s550_s28  ;;  %p556_p2 = scmp.lt.s32.totalorder %s550_s28, %s550_s28 }
   0x6   :  { %p557_p3 = por %p556_p2, %p555_p1 }
   0x8   :  { %p558_p4 = pnand %p557_p3, %p551_p0 }
   0xa   :  { %561 = shalt.err (!%p558_p4)
}
   0xb   :  { %s608_s29 = smov 128   ;;  %s609_s30 = smov 8  }
   0xc   :  { %41 = dma.hbm_to_vmem [thread:$0]  %s734_s3, 2048, %s36_s25, [#allocation5], %s608_s29, %s608_s29, %s609_s30  }
   0xd   :  { %s570_s10 = scalar_lea.vmem %s22_s27, 2048  ;;  %p575_p6 = scmp.lt.s32.totalorder %s22_s27, %s22_s27 }
   0xe   :  { %p571_p5 = scmp.ne.s32.totalorder %s22_s27, %s570_s10  ;;  %p576_p7 = scmp.lt.s32.totalorder %s570_s10, %s570_s10 }
  0x10   :  { %p577_p8 = por %p576_p7, %p575_p6 }
  0x12   :  { %p578_p9 = pnand %p577_p8, %p571_p5 }
  0x14   :  { %581 = shalt.err (!%p578_p9)
}
  0x15   :  { %27 = dma.hbm_to_vmem [thread:$0]  %s732_s1, 2048, %s22_s27, [#allocation3], %s608_s29, %s608_s29, %s609_s30  }
  0x16   :  { %s610_s13 = smov [#allocation6]  }
  0x17   :  { %s49_s14 = sshll.u32 %s610_s13, 4  ;;  %s50_s14 = int_to_ptr.vmem [resolvable:$true] %s49_s14 }
  0x18   :  { %s590_s15 = scalar_lea.vmem %s50_s14, 2048  ;;  %p595_p11 = scmp.lt.s32.totalorder %s50_s14, %s50_s14 }
  0x19   :  { %p591_p10 = scmp.ne.s32.totalorder %s50_s14, %s590_s15  ;;  %p596_p12 = scmp.lt.s32.totalorder %s590_s15, %s590_s15 }
  0x1b   :  { %p597_p13 = por %p596_p12, %p595_p11 }
  0x1d   :  { %p598_p0 = pnand %p597_p13, %p591_p10 }
  0x1f   :  { %601 = shalt.err (!%p598_p0)
}
  0x20   :  { %55 = dma.hbm_to_vmem [thread:$0]  %s736_s5, 2048, %s50_s14, [#allocation5], %s608_s29, %s608_s29, %s609_s30  }
  0x21   :  { %602 = dma.done.wait [#allocation3], 2048  }
  0x22   :  { %603 = vsyncadd [#allocation3], 4294965248 }
  0x23   :  { %604 = dma.done.wait [#allocation5], 4096  }
  0x24   :  { %605 = vsyncadd [#allocation5], 4294963200  ;;  %v611_v0 = vmov 0.0   ;;  %vm612_vm0 = vmmov 0   ;;  %v83_v1 = vld [vmem:[#allocation2 + $0x78] sm:$0xff]  ;;  %v82_v2 = vld [vmem:[#allocation2 + $0x70] sm:$0xff] }
  0x25   :  { %426 = vmatprep.subr.mxu0 %v611_v0  ;;  %458 = vmatprep.mubr.msk.f32.mxu0 %vm612_vm0, %v611_v0  ;;  %v81_v3 = vld [vmem:[#allocation2 + $0x68] sm:$0xff]  ;;  %v80_v4 = vld [vmem:[#allocation2 + $0x60] sm:$0xff]  ;;  %v184_v5 = vld [vmem:[#allocation4 + $0x78] sm:$0xff] }
  0x26   :  { %461 = vmatprep.subr.mxu1 %v611_v0  ;;  %493 = vmatprep.mubr.msk.f32.mxu1 %vm612_vm0, %v611_v0  ;;  %v79_v6 = vld [vmem:[#allocation2 + $0x58] sm:$0xff]  ;;  %v183_v7 = vld [vmem:[#allocation4 + $0x70] sm:$0xff]  ;;  %v77_v9 = vld [vmem:[#allocation2 + $0x48] sm:$0xff] }
  0x27   :  { %427 = vmatpush3.msra.mxu0 %v83_v1  ;;  %462 = vmatpush3.msra.mxu1 %v184_v5  ;;  %v78_v8 = vld [vmem:[#allocation2 + $0x50] sm:$0xff]  ;;  %v76_v10 = vld [vmem:[#allocation2 + $0x40] sm:$0xff]  ;;  %v75_v11 = vld [vmem:[#allocation2 + $0x38] sm:$0xff] }
  0x28   :  { %428 = vmatprep.subr.mxu0 %v611_v0  ;;  %463 = vmatprep.subr.mxu1 %v611_v0  ;;  %v74_v12 = vld [vmem:[#allocation2 + $0x30] sm:$0xff]  ;;  %v73_v13 = vld [vmem:[#allocation2 + $0x28] sm:$0xff]  ;;  %v72_v14 = vld [vmem:[#allocation2 + $0x20] sm:$0xff] }
  0x29   :  { %429 = vmatpush3.msra.mxu0 %v82_v2  ;;  %464 = vmatpush3.msra.mxu1 %v183_v7  ;;  %v71_v15 = vld [vmem:[#allocation2 + $0x18] sm:$0xff]  ;;  %v70_v16 = vld [vmem:[#allocation2 + $0x10] sm:$0xff]  ;;  %v69_v17 = vld [vmem:[#allocation2 + $0x8] sm:$0xff] }
  0x2a   :  { %430 = vmatprep.subr.mxu0 %v611_v0  ;;  %465 = vmatprep.subr.mxu1 %v611_v0  ;;  %v68_v18 = vld [vmem:[#allocation2] sm:$0xff]  ;;  %v182_v20 = vld [vmem:[#allocation4 + $0x68] sm:$0xff]  ;;  %v180_v22 = vld [vmem:[#allocation4 + $0x58] sm:$0xff] }
  0x2b   :  { %431 = vmatpush3.msra.mxu0 %v81_v3  ;;  %v67_v19 = vld [vmem:[%s731_s0] sm:$0xff]  ;;  %466 = vmatpush3.msra.mxu1 %v182_v20  ;;  %v179_v23 = vld [vmem:[#allocation4 + $0x50] sm:$0xff]  ;;  %v178_v24 = vld [vmem:[#allocation4 + $0x48] sm:$0xff] }
  0x2c   :  { %432 = vmatprep.subr.mxu0 %v611_v0  ;;  %467 = vmatprep.subr.mxu1 %v611_v0  ;;  %v181_v21 = vld [vmem:[#allocation4 + $0x60] sm:$0xff]  ;;  %v176_v26 = vld [vmem:[#allocation4 + $0x38] sm:$0xff]  ;;  %v175_v27 = vld [vmem:[#allocation4 + $0x30] sm:$0xff] }
  0x2d   :  { %433 = vmatpush3.msra.mxu0 %v80_v4  ;;  %468 = vmatpush3.msra.mxu1 %v181_v21  ;;  %v177_v25 = vld [vmem:[#allocation4 + $0x40] sm:$0xff]  ;;  %v174_v28 = vld [vmem:[#allocation4 + $0x28] sm:$0xff]  ;;  %v172_v30 = vld [vmem:[#allocation4 + $0x18] sm:$0xff] }
  0x2e   :  { %434 = vmatprep.subr.mxu0 %v611_v0  ;;  %469 = vmatprep.subr.mxu1 %v611_v0  ;;  %v173_v29 = vld [vmem:[#allocation4 + $0x20] sm:$0xff]  ;;  %v171_v31 = vld [vmem:[#allocation4 + $0x10] sm:$0xff]  ;;  %v170_v32 = vld [vmem:[#allocation4 + $0x8] sm:$0xff] }
  0x2f   :  { %435 = vmatpush3.msra.mxu0 %v79_v6  ;;  %470 = vmatpush3.msra.mxu1 %v180_v22  ;;  %v169_v33 = vld [vmem:[#allocation4] sm:$0xff]  ;;  %v285_v34 = vld [vmem:[#allocation6 + $0x78] sm:$0xff]  ;;  %v284_v35 = vld [vmem:[#allocation6 + $0x70] sm:$0xff] }
  0x30   :  { %436 = vmatprep.subr.mxu0 %v611_v0  ;;  %471 = vmatprep.subr.mxu1 %v611_v0  ;;  %v370_v36 = vld [vmem:[%s733_s2] ss:$0 sm:$0xff]  ;;  %v283_v47 = vld [vmem:[#allocation6 + $0x68] sm:$0xff]  ;;  %v281_v49 = vld [vmem:[#allocation6 + $0x58] sm:$0xff] }
  0x31   :  { %437 = vmatpush3.msra.mxu0 %v78_v8  ;;  %472 = vmatpush3.msra.mxu1 %v179_v23  ;;  %v282_v48 = vld [vmem:[#allocation6 + $0x60] sm:$0xff]  ;;  %v280_v50 = vld [vmem:[#allocation6 + $0x50] sm:$0xff]  ;;  %v279_v51 = vld [vmem:[#allocation6 + $0x48] sm:$0xff] }
  0x32   :  { %438 = vmatprep.subr.mxu0 %v611_v0  ;;  %473 = vmatprep.subr.mxu1 %v611_v0  ;;  %v278_v52 = vld [vmem:[#allocation6 + $0x40] sm:$0xff]  ;;  %v277_v53 = vld [vmem:[#allocation6 + $0x38] sm:$0xff]  ;;  %v276_v54 = vld [vmem:[#allocation6 + $0x30] sm:$0xff] }
  0x33   :  { %439 = vmatpush3.msra.mxu0 %v77_v9  ;;  %474 = vmatpush3.msra.mxu1 %v178_v24  ;;  %v275_v55 = vld [vmem:[#allocation6 + $0x28] sm:$0xff]  ;;  %v274_v56 = vld [vmem:[#allocation6 + $0x20] sm:$0xff]  ;;  %v273_v57 = vld [vmem:[#allocation6 + $0x18] sm:$0xff] }
  0x34   :  { %440 = vmatprep.subr.mxu0 %v611_v0  ;;  %475 = vmatprep.subr.mxu1 %v611_v0  ;;  %v272_v58 = vld [vmem:[#allocation6 + $0x10] sm:$0xff]  ;;  %v271_v59 = vld [vmem:[#allocation6 + $0x8] sm:$0xff]  ;;  %v270_v60 = vld [vmem:[#allocation6] sm:$0xff] }
  0x35   :  { %441 = vmatpush3.msra.mxu0 %v76_v10  ;;  %476 = vmatpush3.msra.mxu1 %v177_v25  ;;  %v372_v61 = vld [vmem:[%s735_s4] ss:$0 sm:$0xff] }
  0x36   :  { %442 = vmatprep.subr.mxu0 %v611_v0  ;;  %477 = vmatprep.subr.mxu1 %v611_v0 }
  0x37   :  { %443 = vmatpush3.msra.mxu0 %v75_v11  ;;  %478 = vmatpush3.msra.mxu1 %v176_v26 }
  0x38   :  { %444 = vmatprep.subr.mxu0 %v611_v0  ;;  %479 = vmatprep.subr.mxu1 %v611_v0 }
  0x39   :  { %445 = vmatpush3.msra.mxu0 %v74_v12  ;;  %480 = vmatpush3.msra.mxu1 %v175_v27 }
  0x3a   :  { %446 = vmatprep.subr.mxu0 %v611_v0  ;;  %481 = vmatprep.subr.mxu1 %v611_v0 }
  0x3b   :  { %447 = vmatpush3.msra.mxu0 %v73_v13  ;;  %482 = vmatpush3.msra.mxu1 %v174_v28 }
  0x3c   :  { %448 = vmatprep.subr.mxu0 %v611_v0  ;;  %483 = vmatprep.subr.mxu1 %v611_v0 }
  0x3d   :  { %449 = vmatpush3.msra.mxu0 %v72_v14  ;;  %484 = vmatpush3.msra.mxu1 %v173_v29 }
  0x3e   :  { %450 = vmatprep.subr.mxu0 %v611_v0  ;;  %485 = vmatprep.subr.mxu1 %v611_v0 }
  0x3f   :  { %451 = vmatpush3.msra.mxu0 %v71_v15  ;;  %486 = vmatpush3.msra.mxu1 %v172_v30 }
  0x40   :  { %452 = vmatprep.subr.mxu0 %v611_v0  ;;  %487 = vmatprep.subr.mxu1 %v611_v0 }
  0x41   :  { %453 = vmatpush3.msra.mxu0 %v70_v16  ;;  %488 = vmatpush3.msra.mxu1 %v171_v31 }
  0x42   :  { %454 = vmatprep.subr.mxu0 %v611_v0  ;;  %489 = vmatprep.subr.mxu1 %v611_v0 }
  0x43   :  { %455 = vmatpush3.msra.mxu0 %v69_v17  ;;  %490 = vmatpush3.msra.mxu1 %v170_v32 }
  0x44   :  { %456 = vmatprep.subr.mxu0 %v611_v0  ;;  %491 = vmatprep.subr.mxu1 %v611_v0 }
  0x45   :  { %457 = vmatpush3.msra.mxu0 %v68_v18  ;;  %492 = vmatpush3.msra.mxu1 %v169_v33 }
  0x46   :  { %459 = vmatmul.mubr.f32.vlgmr.msra.gmra.mxu0 %v67_v19  ;;  %496 = vmatprep.subr.mxu0 %v611_v0 }
  0x47   :  { %528 = vmatprep.mubr.msk.f32.mxu0 %vm612_vm0, %v611_v0  ;;  %497 = vmatpush3.msra.mxu0 %v285_v34 }
  0x48   :  { %498 = vmatprep.subr.mxu0 %v611_v0 }
  0x49   :  { %499 = vmatpush3.msra.mxu0 %v284_v35 }
  0x4a   :  { %500 = vmatprep.subr.mxu0 %v611_v0 }
  0x4b   :  { %501 = vmatpush3.msra.mxu0 %v283_v47 }
  0x4c   :  { %502 = vmatprep.subr.mxu0 %v611_v0 }
  0x4d   :  { %503 = vmatpush3.msra.mxu0 %v282_v48 }
  0x4e   :  { %504 = vmatprep.subr.mxu0 %v611_v0 }
  0x4f   :  { %505 = vmatpush3.msra.mxu0 %v281_v49 }
  0x50   :  { %506 = vmatprep.subr.mxu0 %v611_v0 }
  0x51   :  { %507 = vmatpush3.msra.mxu0 %v280_v50 }
  0x52   :  { %508 = vmatprep.subr.mxu0 %v611_v0 }
  0x53   :  { %509 = vmatpush3.msra.mxu0 %v279_v51 }
  0x54   :  { %510 = vmatprep.subr.mxu0 %v611_v0 }
  0x55   :  { %511 = vmatpush3.msra.mxu0 %v278_v52 }
  0x56   :  { %512 = vmatprep.subr.mxu0 %v611_v0 }
  0x57   :  { %513 = vmatpush3.msra.mxu0 %v277_v53 }
  0x58   :  { %514 = vmatprep.subr.mxu0 %v611_v0 }
  0x59   :  { %515 = vmatpush3.msra.mxu0 %v276_v54 }
  0x5a   :  { %516 = vmatprep.subr.mxu0 %v611_v0 }
  0x5b   :  { %517 = vmatpush3.msra.mxu0 %v275_v55 }
  0x5c   :  { %518 = vmatprep.subr.mxu0 %v611_v0 }
  0x5d   :  { %519 = vmatpush3.msra.mxu0 %v274_v56 }
  0x5e   :  { %520 = vmatprep.subr.mxu0 %v611_v0 }
  0x5f   :  { %521 = vmatpush3.msra.mxu0 %v273_v57 }
  0x60   :  { %522 = vmatprep.subr.mxu0 %v611_v0 }
  0x61   :  { %523 = vmatpush3.msra.mxu0 %v272_v58 }
  0x62   :  { %524 = vmatprep.subr.mxu0 %v611_v0 }
  0x63   :  { %525 = vmatpush3.msra.mxu0 %v271_v59 }
  0x64   :  { %526 = vmatprep.subr.mxu0 %v611_v0  ;;  %v374_v0 = vld [vmem:[%s737_s6] ss:$0 sm:$0xff] }
  0x65   :  { %527 = vmatpush3.msra.mxu0 %v270_v60 }
 0x106   :  { %v157_v37 = vpop.f32.mrf.mxu0 }
 0x107   :  { %v158_v38 = vadd.f32 %v370_v36, %v157_v37 }
 0x108   :  { %v460_v39 = vpop.f32.mrf.mxu0 }
 0x109   :  { %v162_v40 = vmin.f32 %v158_v38, 0.0  ;;  %vm161_vm1 = vcmp.gt.f32.partialorder %v158_v38, 0.0 }
 0x10b   :  { %v163_v41 = vmul.f32 1.442695, %v162_v40 }
 0x10d   :  { %538 = vpow2.f32 %v163_v41 }
 0x11a   :  { %v539_v42 = vpop.eup %538 }
 0x11b   :  { %v371_v43 = vadd.f32 -1.0, %v539_v42 }
 0x11d   :  { %v166_v44 = vmul.f32 1.6732632, %v371_v43 }
 0x11f   :  { %v167_v45 = vsel %vm161_vm1, %v158_v38, %v166_v44 }
 0x120   :  { %v168_v46 = vmul.f32 1.050701, %v167_v45 }
 0x122   :  { %494 = vmatmul.mubr.f32.vlgmr.msra.gmra.mxu1 %v168_v46 }
 0x1e2   :  { %v258_v62 = vpop.f32.mrf.mxu1 }
 0x1e3   :  { %v259_v63 = vadd.f32 %v372_v61, %v258_v62 }
 0x1e4   :  { %v495_v1 = vpop.f32.mrf.mxu1 }
 0x1e5   :  { %v263_v2 = vmin.f32 %v259_v63, 0.0  ;;  %vm262_vm2 = vcmp.gt.f32.partialorder %v259_v63, 0.0 }
 0x1e7   :  { %v264_v3 = vmul.f32 1.442695, %v263_v2 }
 0x1e9   :  { %540 = vpow2.f32 %v264_v3 }
 0x1f6   :  { %v541_v4 = vpop.eup %540 }
 0x1f7   :  { %v373_v5 = vadd.f32 -1.0, %v541_v4 }
 0x1f9   :  { %v267_v6 = vmul.f32 1.6732632, %v373_v5 }
 0x1fb   :  { %v268_v7 = vsel %vm262_vm2, %v259_v63, %v267_v6 }
 0x1fc   :  { %v269_v8 = vmul.f32 1.050701, %v268_v7 }
 0x1fe   :  { %529 = vmatmul.mubr.f32.vlgmr.msra.gmra.mxu0 %v269_v8 }
 0x2be   :  { %v359_v9 = vpop.f32.mrf.mxu0 }
 0x2bf   :  { %v360_v10 = vadd.f32 %v374_v0, %v359_v9 }
 0x2c0   :  { %v530_v11 = vpop.f32.mrf.mxu0 }
 0x2c1   :  { %363 = vst [vmem:[%s738_s7] sm:$0xff] %v360_v10 }
 0x2c2   :  { %368 = vsyncpa [#allocation3], 1 }
 0x2c3   :  { %369 = vsyncpa [#allocation5], 1 }

</bundles_post_ra>
